<compile_context>
chip_gen: v7x
topology: tpu7x:2x2x1
jax: 0.10.0
libtpu: 0.0.40
codegen_flags: <defaults>
</compile_context>

<pallas_src>
import jax
import jax.numpy as jnp
from jax.experimental import pallas as pl
from jax.experimental.pallas import tpu as pltpu


def _h_sigmoid_kernel(x_ref, o_ref):
    x = x_ref[...]
    # ReLU6(x + 2) / 4 == clamp(x + 2, 0, 6) * 0.25
    o_ref[...] = (jnp.clip(x + 2.0, 0.0, 6.0) * 0.25).astype(o_ref.dtype)


def _h_sigmoid_jnp(x):
    return jnp.clip(x + 2.0, 0.0, 6.0) * 0.25


def _num_tensorcores() -> int:
    """Best-effort count of TensorCores per device (v7x has 2, v5e/v6e have 1)."""
    try:
        dev = jax.devices()[0]
        return max(1, int(getattr(dev, "num_cores", 1)))
    except Exception:
        return 1


def h_sigmoid(x: jax.Array, *, tile_bytes: int = 4 << 20) -> jax.Array:
    """Elementwise: ReLU6(x + 2) / 4. Accepts any shape / float dtype."""
    orig_shape = x.shape
    dtype = x.dtype
    n = x.size
    if n == 0:
        return x

    lanes = 128
    itemsize = jnp.dtype(dtype).itemsize
    sublane = max(8, 32 // itemsize)  # packed-sublane multiple: 8 f32, 16 bf16, 32 int8

    x_flat = jnp.ravel(x)
    rows = n // lanes                 # full 128-lane rows
    tail = n - rows * lanes           # < 128 leftover elements

    # Tiny inputs (< one 128-lane row): not worth a kernel launch.
    if rows == 0:
        return _h_sigmoid_jnp(x_flat).astype(dtype).reshape(orig_shape)

    # Kernel operates on the 128-aligned prefix only (free reshape when tail == 0).
    x_main = x_flat[: rows * lanes] if tail else x_flat
    x2d = x_main.reshape(rows, lanes)

    # ---- tile sizing -------------------------------------------------------
    # ~4 MiB per tile amortizes the ~0.35us per-grid-step overhead on all gens
    # (matters most at v7x's 3.2 TB/s HBM). Double-buffered in+out = 16 MiB VMEM.
    block_rows = max(sublane, (tile_bytes // (lanes * itemsize)) // sublane * sublane)

    num_cores = _num_tensorcores()
    if rows <= block_rows:
        if num_cores >= 2 and rows >= 2 * sublane:
            # Multi-TC part (v7x): force >=2 grid steps so the parallel axis can
            # shard across both TensorCores' DMA paths.
            block_rows = ((pl.cdiv(rows, 2) + sublane - 1) // sublane) * sublane
        else:
            # Single-TC part (v5e/v6e): one block, no pointless extra grid step.
            block_rows = ((rows + sublane - 1) // sublane) * sublane

    grid = (pl.cdiv(rows, block_rows),)  # ragged final block masked by Pallas

    n_main = rows * lanes
    cost = pl.CostEstimate(
        flops=4 * n_main, transcendentals=0, bytes_accessed=2 * n_main * itemsize
    )

    out2d = pl.pallas_call(
        _h_sigmoid_kernel,
        out_shape=jax.ShapeDtypeStruct((rows, lanes), dtype),
        grid_spec=pltpu.PrefetchScalarGridSpec(
            num_scalar_prefetch=0,
            grid=grid,
            in_specs=[pl.BlockSpec((block_rows, lanes), lambda i: (i, 0))],
            out_specs=pl.BlockSpec((block_rows, lanes), lambda i: (i, 0)),
        ),
        compiler_params=pltpu.CompilerParams(
            # TODO(synk): if xprof on v7x shows a single TC active, switch this
            # grid axis to pltpu.CORE_PARALLEL (plain "parallel" may not shard).
            dimension_semantics=("parallel",),
            vmem_limit_bytes=32 * 1024 * 1024,
        ),
        cost_estimate=cost,
    )(x2d)

    out_main = out2d.reshape(-1)
    if tail:
        out_tail = _h_sigmoid_jnp(x_flat[rows * lanes:]).astype(dtype)
        out_flat = jnp.concatenate([out_main, out_tail])
    else:
        out_flat = out_main
    return out_flat.reshape(orig_shape)


if __name__ == "__main__":
    key = jax.random.PRNGKey(0)

    # NCHW input like the PyTorch module would see (2048 elems -> 128-aligned path).
    x = jax.random.normal(key, (2, 4, 16, 16), dtype=jnp.float32) * 4.0
    y = jax.block_until_ready(h_sigmoid(x))
    y_ref = jnp.clip(x + 2.0, 0.0, 6.0) / 4.0
    assert y.shape == x.shape
    assert jnp.allclose(y, y_ref, atol=1e-6, rtol=1e-6)

    # Odd-sized input to exercise the ragged (aligned-prefix + jnp tail) path.
    x2 = jax.random.normal(jax.random.PRNGKey(1), (2, 3, 17, 19), dtype=jnp.float32) * 4.0
    y2 = jax.block_until_ready(h_sigmoid(x2))
    y2_ref = jnp.clip(x2 + 2.0, 0.0, 6.0) / 4.0
    assert y2.shape == x2.shape
    assert jnp.allclose(y2, y2_ref, atol=1e-6, rtol=1e-6)

    # Sub-128-element input exercises the pure-jnp fallback.
    x3 = jax.random.normal(jax.random.PRNGKey(2), (3, 5, 4), dtype=jnp.float32) * 4.0
    y3 = jax.block_until_ready(h_sigmoid(x3))
    y3_ref = jnp.clip(x3 + 2.0, 0.0, 6.0) / 4.0
    assert y3.shape == x3.shape
    assert jnp.allclose(y3, y3_ref, atol=1e-6, rtol=1e-6)

    # bf16 input: checks the dtype-aware (16-row sublane) tile rounding.
    xb = (jax.random.normal(jax.random.PRNGKey(3), (2, 4, 16, 16)) * 4.0).astype(jnp.bfloat16)
    yb = jax.block_until_ready(h_sigmoid(xb))
    yb_ref = (jnp.clip(xb.astype(jnp.float32) + 2.0, 0.0, 6.0) / 4.0).astype(jnp.bfloat16)
    assert yb.shape == xb.shape
    assert jnp.allclose(yb.astype(jnp.float32), yb_ref.astype(jnp.float32), atol=2e-2, rtol=2e-2)

    print("KERNEL_OK")
</pallas_src>

<mosaic_0001>
module attributes {stable_mosaic.version = 11 : i64} {
  func.func @_h_sigmoid_kernel(%arg0: i32, %arg1: memref<16x128xf32, #tpu.memory_space<vmem>>, %arg2: memref<16x128xf32, #tpu.memory_space<vmem>>) attributes {dimension_semantics = [#tpu.dimension_semantics<parallel>], iteration_bounds = array<i64: 1>, scalar_prefetch = 0 : i64, scratch_operands = 0 : i64, tpu.core_type = #tpu.core_type<tc>, window_params = [{transform_indices = @transform_0, window_bounds = array<i64: 16, 128>}, {transform_indices = @transform_1, window_bounds = array<i64: 16, 128>}]} {
    %c0 = arith.constant 0 : index
    %c0_0 = arith.constant 0 : index
    %0 = vector.load %arg1[%c0, %c0_0] : memref<16x128xf32, #tpu.memory_space<vmem>>, vector<16x128xf32>
    %cst = arith.constant 2.000000e+00 : f32
    %1 = vector.broadcast %cst : f32 to vector<16x128xf32>
    %2 = arith.addf %0, %1 : vector<16x128xf32>
    %cst_1 = arith.constant 0.000000e+00 : f32
    %cst_2 = arith.constant 6.000000e+00 : f32
    %3 = vector.broadcast %cst_1 : f32 to vector<16x128xf32>
    %4 = arith.maximumf %3, %2 : vector<16x128xf32>
    %5 = vector.broadcast %cst_2 : f32 to vector<16x128xf32>
    %6 = arith.minimumf %5, %4 : vector<16x128xf32>
    %cst_3 = arith.constant 2.500000e-01 : f32
    %7 = vector.broadcast %cst_3 : f32 to vector<16x128xf32>
    %8 = arith.mulf %6, %7 : vector<16x128xf32>
    %c0_4 = arith.constant 0 : index
    %c0_5 = arith.constant 0 : index
    %9 = vector.load %arg2[%c0_4, %c0_5] : memref<16x128xf32, #tpu.memory_space<vmem>>, vector<16x128xf32>
    tpu.vector_store %arg2[%c0_4, %c0_5], %8 {strides = array<i32>} : memref<16x128xf32, #tpu.memory_space<vmem>>, vector<16x128xf32>,
    return
  }
  func.func @transform_0(%arg0: i32) -> (i32, i32) {
    %c0_i32 = arith.constant 0 : i32
    %c0_i32_0 = arith.constant 0 : i32
    return %arg0, %c0_i32 : i32, i32
  }
  func.func @transform_1(%arg0: i32) -> (i32, i32) {
    %c0_i32 = arith.constant 0 : i32
    %c0_i32_0 = arith.constant 0 : i32
    return %arg0, %c0_i32 : i32, i32
  }
}

</mosaic_0001>

<bundles_post_ra>
// kernel: tpu_custom_call.1
= control target key start
LH: loop header
LB: loop body
LE: loop exit
PB: predicated region body
PF: predicated region fallthrough
CT: control target
= control target key end

     0   :  { %6 = vsyncpa [#allocation3], 0  ;;  %s148_s0 = inlined_call_operand.hbm [shape: f32[16,128], index: 0, kind: input, shape index: {}]   ;;  %s149_s1 = inlined_call_operand.hbm [shape: f32[16,128], index: 1, kind: output, shape index: {}]  }
   0x1   :  { %7 = vsyncpa [#allocation4], 0  ;;  %s104_s6 = smov [#allocation2]   ;;  %s56_s10 = scalar_lea.hbm %s148_s0, 256 }
   0x2   :  { %s13_s7 = sshll.u32 %s104_s6, 4  ;;  %p57_p0 = scmp.ne.s32.totalorder %s148_s0, %s56_s10  ;;  %s14_s7 = int_to_ptr.vmem [resolvable:$true] %s13_s7 }
   0x3   :  { %p60_p1 = scmp.lt.u32.totalorder %s56_s10, %s148_s0 }
   0x5   :  { %p62_p2 = pnand %p60_p1, %p57_p0 }
   0x7   :  { %65 = shalt.err (!%p62_p2)
}
   0x8   :  { %s66_s15 = scalar_lea.vmem %s14_s7, 256  ;;  %p71_p4 = scmp.lt.s32.totalorder %s14_s7, %s14_s7 }
   0x9   :  { %p67_p3 = scmp.ne.s32.totalorder %s14_s7, %s66_s15  ;;  %p72_p5 = scmp.lt.s32.totalorder %s66_s15, %s66_s15 }
   0xb   :  { %p73_p6 = por %p72_p5, %p71_p4 }
   0xd   :  { %p74_p7 = pnand %p73_p6, %p67_p3 }
   0xf   :  { %77 = shalt.err (!%p74_p7)
}
  0x10   :  { %s105_s16 = smov 128   ;;  %s106_s17 = smov 8  }
  0x11   :  { %19 = dma.hbm_to_vmem [thread:$0]  %s148_s0, 256, %s14_s7, [#allocation3], %s105_s16, %s105_s16, %s106_s17  }
  0x12   :  { %100 = dma.done.wait [#allocation3], 256  }
  0x13   :  { %101 = vsyncadd [#allocation3], 4294967040  ;;  %v23_v0 = vld [vmem:[#allocation2] sm:$0xff]  ;;  %v24_v1 = vld [vmem:[#allocation2 + $0x8] sm:$0xff]  ;;  %s107_s20 = smov [#allocation5]  }
  0x14   :  { %v25_v2 = vadd.f32 2.0, %v23_v0  ;;  %v26_v3 = vadd.f32 2.0, %v24_v1  ;;  %s40_s21 = sshll.u32 %s107_s20, 4  ;;  %s41_s21 = int_to_ptr.vmem [resolvable:$true] %s40_s21 }
  0x15   :  { %s78_s22 = scalar_lea.vmem %s41_s21, 256  ;;  %p83_p9 = scmp.lt.s32.totalorder %s41_s21, %s41_s21 }
  0x16   :  { %v27_v4 = vmax.f32 %v25_v2, 0.0  ;;  %v28_v5 = vmax.f32 %v26_v3, 0.0  ;;  %p79_p8 = scmp.ne.s32.totalorder %s41_s21, %s78_s22  ;;  %p84_p10 = scmp.lt.s32.totalorder %s78_s22, %s78_s22 }
  0x18   :  { %v29_v6 = vmin.f32 %v27_v4, 6.0  ;;  %v30_v7 = vmin.f32 %v28_v5, 6.0  ;;  %p85_p11 = por %p84_p10, %p83_p9 }
  0x1a   :  { %v31_v8 = vmul.f32 0.25, %v29_v6  ;;  %v32_v9 = vmul.f32 0.25, %v30_v7  ;;  %p86_p12 = pnand %p85_p11, %p79_p8 }
  0x1c   :  { %33 = vst [vmem:[#allocation5] sm:$0xff] %v31_v8  ;;  %34 = vst [vmem:[#allocation5 + $0x8] sm:$0xff] %v32_v9 }
  0x1d   :  { %89 = shalt.err (!%p86_p12)
}
  0x1e   :  { %s90_s24 = scalar_lea.hbm %s149_s1, 256 }
  0x1f   :  { %p91_p13 = scmp.ne.s32.totalorder %s149_s1, %s90_s24  ;;  %p94_p0 = scmp.lt.u32.totalorder %s90_s24, %s149_s1 }
  0x21   :  { %p96_p1 = pnand %p94_p0, %p91_p13 }
  0x23   :  { %99 = shalt.err (!%p96_p1)
}
  0x24   :  { %46 = dma.vmem_to_hbm [thread:$0]  %s41_s21, 256, %s149_s1, [#allocation4], %s105_s16, %s105_s16, %s106_s17  }
  0x25   :  { %102 = dma.done.wait [#allocation4], 256  }
  0x26   :  { %103 = vsyncadd [#allocation4], 4294967040 }
  0x27   :  { %50 = vsyncpa [#allocation3], 1 }
  0x28   :  { %51 = vsyncpa [#allocation4], 1 }

</bundles_post_ra>
